<compile_context>
chip_gen: v7x
topology: tpu7x:2x2x1
jax: 0.10.0
libtpu: 0.0.40
codegen_flags: <defaults>
</compile_context>

<pallas_src>
import numpy as np
import jax
import jax.numpy as jnp
from jax.experimental import pallas as pl
from jax.experimental.pallas import tpu as pltpu


# ----------------------------------------------------------------------------
# beta schedule (deterministic parameter setup, mirrors get_beta_schedule)
# ----------------------------------------------------------------------------
def get_beta_schedule(beta_schedule, *, beta_start, beta_end, num_diffusion_timesteps):
    def sigmoid(x):
        return 1 / (np.exp(-x) + 1)

    if beta_schedule == 'quad':
        betas = np.linspace(beta_start ** 0.5, beta_end ** 0.5,
                            num_diffusion_timesteps, dtype=np.float64) ** 2
    elif beta_schedule == 'linear':
        betas = np.linspace(beta_start, beta_end, num_diffusion_timesteps, dtype=np.float64)
    elif beta_schedule == 'const':
        betas = beta_end * np.ones(num_diffusion_timesteps, dtype=np.float64)
    elif beta_schedule == 'jsd':
        betas = 1.0 / np.linspace(num_diffusion_timesteps, 1,
                                  num_diffusion_timesteps, dtype=np.float64)
    elif beta_schedule == 'sigmoid':
        betas = np.linspace(-6, 6, num_diffusion_timesteps)
        betas = sigmoid(betas) * (beta_end - beta_start) + beta_start
    else:
        raise NotImplementedError(beta_schedule)
    assert betas.shape == (num_diffusion_timesteps,)
    return betas


# ----------------------------------------------------------------------------
# Pallas kernels
# ----------------------------------------------------------------------------
def _dwt_norm_kernel(img_ref, ph_ref, norm_ref, sub_ref):
    # Fused data_transform: norm = 2*img - 1  (independent tile of the image)
    norm_ref[...] = 2.0 * img_ref[...] - 1.0

    # Haar DWT butterfly on the four spatial phases (12 VALU ops).
    x1 = ph_ref[0]          # (even row, even col)
    x2 = ph_ref[1]          # (odd  row, even col)
    x3 = ph_ref[2]          # (even row, odd  col)
    x4 = ph_ref[3]          # (odd  row, odd  col)
    s12 = 0.5 * (x1 + x2)
    s34 = 0.5 * (x3 + x4)
    d21 = 0.5 * (x2 - x1)
    d43 = 0.5 * (x4 - x3)
    sub_ref[0] = s12 + s34          # LL
    sub_ref[1] = s34 - s12          # HL
    sub_ref[2] = d21 + d43          # LH
    sub_ref[3] = d43 - d21          # HH


def _iwt_kernel(sub_ref, out_ref):
    # Inverse Haar butterfly (12 VALU ops); outputs are the four spatial phases
    # indexed as p = row_parity*2 + col_parity.
    x1 = sub_ref[0]         # LL
    x2 = sub_ref[1]         # HL
    x3 = sub_ref[2]         # LH
    x4 = sub_ref[3]         # HH
    a = 0.5 * (x1 - x2)
    b = 0.5 * (x3 - x4)
    c = 0.5 * (x1 + x2)
    d = 0.5 * (x3 + x4)
    out_ref[0] = a - b      # h[0::2, 0::2]
    out_ref[1] = c - d      # h[0::2, 1::2]
    out_ref[2] = a + b      # h[1::2, 0::2]
    out_ref[3] = c + d      # h[1::2, 1::2]


# ----------------------------------------------------------------------------
# tiling helpers / wrappers
# ----------------------------------------------------------------------------
_VMEM_LIMIT = 32 * 1024 * 1024  # safe on v5e/v6e/v7x, plenty for ~1 MiB blocks


def _pick_block(dim, target, align):
    """Largest legal block size: the full dim, or `target` rounded to `align`."""
    if dim <= target:
        return dim
    return max(align, (target // align) * align)


def dwt_with_norm(img, *, bm_target=256, bl_target=256):
    """Fused data_transform + WaveletTransform.dwt.

    img: (n, c, h, w)  ->  (norm (n,c,h,w), dwt (4n, c, h/2, w/2) [LL;HL;LH;HH])
    """
    n, c, h, w = img.shape
    assert h % 2 == 0 and w % 2 == 0
    h2, w2 = h // 2, w // 2
    nc, hw2 = n * c, h2 * w2
    dt = img.dtype

    # Layout glue (single XLA pass): de-interleave the 2x2 spatial phases into
    # four contiguous lane-dense slabs ordered [x1, x2, x3, x4].
    phases = jnp.transpose(img.reshape(n, c, h2, 2, w2, 2), (5, 3, 0, 1, 2, 4))
    phases = phases.reshape(4, nc, hw2)
    img2d = img.reshape(nc, 4 * hw2)        # free reshape (h*w == 4*hw2)

    bm = _pick_block(nc, bm_target, 8)
    bl = _pick_block(hw2, bl_target, 128)
    grid = (pl.cdiv(nc, bm), pl.cdiv(hw2, bl))

    norm2d, sub = pl.pallas_call(
        _dwt_norm_kernel,
        out_shape=(jax.ShapeDtypeStruct((nc, 4 * hw2), dt),
                   jax.ShapeDtypeStruct((4, nc, hw2), dt)),
        grid=grid,
        in_specs=[pl.BlockSpec((bm, 4 * bl), lambda i, j: (i, j)),
                  pl.BlockSpec((4, bm, bl), lambda i, j: (0, i, j))],
        out_specs=(pl.BlockSpec((bm, 4 * bl), lambda i, j: (i, j)),
                   pl.BlockSpec((4, bm, bl), lambda i, j: (0, i, j))),
        compiler_params=pltpu.CompilerParams(
            dimension_semantics=("parallel", "parallel"),
            vmem_limit_bytes=_VMEM_LIMIT),
    )(img2d, phases)

    norm = norm2d.reshape(n, c, h, w)
    dwt = sub.reshape(4 * n, c, h2, w2)     # same layout as torch.cat(..., 0)
    return norm, dwt


def wavelet_iwt(x, *, bm_target=256, bl_target=256):
    """WaveletTransform.iwt: (4n, c, h, w) -> (n, c, 2h, 2w)."""
    ib, c, h, w = x.shape
    ob = ib // 4
    obc, hw = ob * c, h * w
    dt = x.dtype

    sub = x.reshape(4, obc, hw)             # free reshape: [x1, x2, x3, x4]

    bm = _pick_block(obc, bm_target, 8)
    bl = _pick_block(hw, bl_target, 128)
    grid = (pl.cdiv(obc, bm), pl.cdiv(hw, bl))

    ph = pl.pallas_call(
        _iwt_kernel,
        out_shape=jax.ShapeDtypeStruct((4, obc, hw), dt),
        grid=grid,
        in_specs=[pl.BlockSpec((4, bm, bl), lambda i, j: (0, i, j))],
        out_specs=pl.BlockSpec((4, bm, bl), lambda i, j: (0, i, j)),
        compiler_params=pltpu.CompilerParams(
            dimension_semantics=("parallel", "parallel"),
            vmem_limit_bytes=_VMEM_LIMIT),
    )(sub)

    # Layout glue (single XLA pass): interleave the 2x2 phases back.
    out = ph.reshape(2, 2, ob, c, h, w)            # [row_par, col_par, ...]
    out = jnp.transpose(out, (2, 3, 4, 0, 5, 1))   # (ob, c, h, rp, w, cp)
    return out.reshape(ob, c, 2 * h, 2 * w)


# ----------------------------------------------------------------------------
# Net.forward (training-mode computable path)
# ----------------------------------------------------------------------------
@jax.jit
def net_forward(x, betas, key):
    n = x.shape[0]
    input_img = x[:, :3, :, :]

    # fused Pallas call: data_transform (2x-1) + Haar DWT butterfly
    input_img_norm, input_dwt = dwt_with_norm(input_img)
    input_LL, input_high0 = input_dwt[:n], input_dwt[n:]

    num_timesteps = betas.shape[0]
    alphas_cumprod = jnp.cumprod(1.0 - betas)

    k1, k2, k3, k4 = jax.random.split(key, 4)
    t1 = jax.random.randint(k1, (input_LL.shape[0] // 2 + 1,), 0, num_timesteps)
    t1 = jnp.concatenate([t1, num_timesteps - t1 - 1], axis=0)[: input_LL.shape[0]]
    a1 = alphas_cumprod[t1].reshape(-1, 1, 1, 1)
    e1 = jax.random.normal(k2, input_LL.shape, input_LL.dtype)

    t2 = jax.random.randint(k3, (input_img.shape[0] // 2 + 1,), 0, num_timesteps)
    t2 = jnp.concatenate([t2, num_timesteps - t2 - 1], axis=0)[: input_img.shape[0]]
    a2 = alphas_cumprod[t2].reshape(-1, 1, 1, 1)
    e2 = jax.random.normal(k4, input_img.shape, input_img.dtype)

    # TODO(synk): eval-mode branch (self.training == False) calls DiffusionUNet
    # (self.Unet) and FGM (self.high_enhance0) inside sample_training; their
    # definitions are not provided in the source, so pred_x_2 is not produced.
    data_dict = {}  # matches PyTorch training-mode forward (returns empty dict)

    intermediates = {
        'input_img_norm': input_img_norm,
        'input_LL': input_LL,
        'input_high0': input_high0,
        'a1': a1, 'e1': e1,
        'a2': a2, 'e2': e2,
        # exercise iwt (used by the eval branch) as a round trip on the dwt output
        'idwt_roundtrip': wavelet_iwt(input_dwt),
    }
    return data_dict, intermediates


# ----------------------------------------------------------------------------
# numpy references (for validation only)
# ----------------------------------------------------------------------------
def dwt_ref(x):
    x01 = x[:, :, 0::2, :] / 2
    x02 = x[:, :, 1::2, :] / 2
    x1 = x01[:, :, :, 0::2]
    x2 = x02[:, :, :, 0::2]
    x3 = x01[:, :, :, 1::2]
    x4 = x02[:, :, :, 1::2]
    return np.concatenate((x1 + x2 + x3 + x4, -x1 - x2 + x3 + x4,
                           -x1 + x2 - x3 + x4, x1 - x2 - x3 + x4), 0)


def iwt_ref(x):
    ib, c, h, w = x.shape
    ob = ib // 4
    x1, x2, x3, x4 = x[:ob] / 2, x[ob:2 * ob] / 2, x[2 * ob:3 * ob] / 2, x[3 * ob:] / 2
    out = np.zeros((ob, c, 2 * h, 2 * w), np.float32)
    out[:, :, 0::2, 0::2] = x1 - x2 - x3 + x4
    out[:, :, 1::2, 0::2] = x1 - x2 + x3 - x4
    out[:, :, 0::2, 1::2] = x1 + x2 - x3 - x4
    out[:, :, 1::2, 1::2] = x1 + x2 + x3 + x4
    return out


if __name__ == "__main__":
    key = jax.random.PRNGKey(0)
    kx, kf = jax.random.split(key)

    # small shapes consistent with the module: x is NCHW with >=3 channels
    x = jax.random.uniform(kx, (2, 4, 16, 16), dtype=jnp.float32)

    betas = jnp.asarray(
        get_beta_schedule('linear', beta_start=1e-4, beta_end=2e-2,
                          num_diffusion_timesteps=20),
        dtype=jnp.float32)

    data_dict, inter = net_forward(x, betas, kf)
    jax.tree_util.tree_map(jax.block_until_ready, (data_dict, inter))

    # validate Pallas kernels against numpy references
    x_np = np.asarray(x)
    img_np = x_np[:, :3, :, :]
    dwt_np = dwt_ref(img_np)

    np.testing.assert_allclose(np.asarray(inter['input_img_norm']),
                               2 * img_np - 1.0, rtol=1e-6, atol=1e-6)
    np.testing.assert_allclose(
        np.concatenate([np.asarray(inter['input_LL']), np.asarray(inter['input_high0'])], 0),
        dwt_np, rtol=1e-6, atol=1e-6)
    np.testing.assert_allclose(np.asarray(inter['idwt_roundtrip']),
                               iwt_ref(dwt_np), rtol=1e-6, atol=1e-6)
    # Haar DWT/IWT as defined is a perfect reconstruction
    np.testing.assert_allclose(np.asarray(inter['idwt_roundtrip']),
                               img_np, rtol=1e-5, atol=1e-5)
    assert data_dict == {}  # PyTorch training-mode forward returns empty dict

    print("KERNEL_OK")
</pallas_src>

<mosaic_0001>
module attributes {stable_mosaic.version = 11 : i64} {
  func.func @_iwt_kernel(%arg0: i32, %arg1: i32, %arg2: memref<4x6x64xf32, #tpu.memory_space<vmem>>, %arg3: memref<4x6x64xf32, #tpu.memory_space<vmem>>) attributes {dimension_semantics = [#tpu.dimension_semantics<parallel>, #tpu.dimension_semantics<parallel>], iteration_bounds = array<i64: 1, 1>, scalar_prefetch = 0 : i64, scratch_operands = 0 : i64, tpu.core_type = #tpu.core_type<tc>, window_params = [{transform_indices = @transform_0, window_bounds = array<i64: 4, 6, 64>}, {transform_indices = @transform_1, window_bounds = array<i64: 4, 6, 64>}]} {
    %c0 = arith.constant 0 : index
    %c0_0 = arith.constant 0 : index
    %c0_1 = arith.constant 0 : index
    %0 = vector.load %arg2[%c0, %c0_0, %c0_1] : memref<4x6x64xf32, #tpu.memory_space<vmem>>, vector<1x6x64xf32>
    %1 = vector.shape_cast %0 : vector<1x6x64xf32> to vector<6x64xf32>
    %c1 = arith.constant 1 : index
    %c0_2 = arith.constant 0 : index
    %c0_3 = arith.constant 0 : index
    %2 = vector.load %arg2[%c1, %c0_2, %c0_3] : memref<4x6x64xf32, #tpu.memory_space<vmem>>, vector<1x6x64xf32>
    %3 = vector.shape_cast %2 : vector<1x6x64xf32> to vector<6x64xf32>
    %c2 = arith.constant 2 : index
    %c0_4 = arith.constant 0 : index
    %c0_5 = arith.constant 0 : index
    %4 = vector.load %arg2[%c2, %c0_4, %c0_5] : memref<4x6x64xf32, #tpu.memory_space<vmem>>, vector<1x6x64xf32>
    %5 = vector.shape_cast %4 : vector<1x6x64xf32> to vector<6x64xf32>
    %c3 = arith.constant 3 : index
    %c0_6 = arith.constant 0 : index
    %c0_7 = arith.constant 0 : index
    %6 = vector.load %arg2[%c3, %c0_6, %c0_7] : memref<4x6x64xf32, #tpu.memory_space<vmem>>, vector<1x6x64xf32>
    %7 = vector.shape_cast %6 : vector<1x6x64xf32> to vector<6x64xf32>
    %8 = arith.subf %1, %3 : vector<6x64xf32>
    %cst = arith.constant 5.000000e-01 : f32
    %9 = vector.broadcast %cst : f32 to vector<6x64xf32>
    %10 = arith.mulf %9, %8 : vector<6x64xf32>
    %11 = arith.subf %5, %7 : vector<6x64xf32>
    %cst_8 = arith.constant 5.000000e-01 : f32
    %12 = vector.broadcast %cst_8 : f32 to vector<6x64xf32>
    %13 = arith.mulf %12, %11 : vector<6x64xf32>
    %14 = arith.addf %1, %3 : vector<6x64xf32>
    %cst_9 = arith.constant 5.000000e-01 : f32
    %15 = vector.broadcast %cst_9 : f32 to vector<6x64xf32>
    %16 = arith.mulf %15, %14 : vector<6x64xf32>
    %17 = arith.addf %5, %7 : vector<6x64xf32>
    %cst_10 = arith.constant 5.000000e-01 : f32
    %18 = vector.broadcast %cst_10 : f32 to vector<6x64xf32>
    %19 = arith.mulf %18, %17 : vector<6x64xf32>
    %20 = arith.subf %10, %13 : vector<6x64xf32>
    %c0_11 = arith.constant 0 : index
    %c0_12 = arith.constant 0 : index
    %c0_13 = arith.constant 0 : index
    %21 = vector.load %arg3[%c0_11, %c0_12, %c0_13] : memref<4x6x64xf32, #tpu.memory_space<vmem>>, vector<1x6x64xf32>
    %22 = vector.shape_cast %21 : vector<1x6x64xf32> to vector<6x64xf32>
    %23 = vector.shape_cast %20 : vector<6x64xf32> to vector<1x6x64xf32>
    tpu.vector_store %arg3[%c0_11, %c0_12, %c0_13], %23 {strides = array<i32>} : memref<4x6x64xf32, #tpu.memory_space<vmem>>, vector<1x6x64xf32>,
    %24 = arith.subf %16, %19 : vector<6x64xf32>
    %c1_14 = arith.constant 1 : index
    %c0_15 = arith.constant 0 : index
    %c0_16 = arith.constant 0 : index
    %25 = vector.load %arg3[%c1_14, %c0_15, %c0_16] : memref<4x6x64xf32, #tpu.memory_space<vmem>>, vector<1x6x64xf32>
    %26 = vector.shape_cast %25 : vector<1x6x64xf32> to vector<6x64xf32>
    %27 = vector.shape_cast %24 : vector<6x64xf32> to vector<1x6x64xf32>
    tpu.vector_store %arg3[%c1_14, %c0_15, %c0_16], %27 {strides = array<i32>} : memref<4x6x64xf32, #tpu.memory_space<vmem>>, vector<1x6x64xf32>,
    %28 = arith.addf %10, %13 : vector<6x64xf32>
    %c2_17 = arith.constant 2 : index
    %c0_18 = arith.constant 0 : index
    %c0_19 = arith.constant 0 : index
    %29 = vector.load %arg3[%c2_17, %c0_18, %c0_19] : memref<4x6x64xf32, #tpu.memory_space<vmem>>, vector<1x6x64xf32>
    %30 = vector.shape_cast %29 : vector<1x6x64xf32> to vector<6x64xf32>
    %31 = vector.shape_cast %28 : vector<6x64xf32> to vector<1x6x64xf32>
    tpu.vector_store %arg3[%c2_17, %c0_18, %c0_19], %31 {strides = array<i32>} : memref<4x6x64xf32, #tpu.memory_space<vmem>>, vector<1x6x64xf32>,
    %32 = arith.addf %16, %19 : vector<6x64xf32>
    %c3_20 = arith.constant 3 : index
    %c0_21 = arith.constant 0 : index
    %c0_22 = arith.constant 0 : index
    %33 = vector.load %arg3[%c3_20, %c0_21, %c0_22] : memref<4x6x64xf32, #tpu.memory_space<vmem>>, vector<1x6x64xf32>
    %34 = vector.shape_cast %33 : vector<1x6x64xf32> to vector<6x64xf32>
    %35 = vector.shape_cast %32 : vector<6x64xf32> to vector<1x6x64xf32>
    tpu.vector_store %arg3[%c3_20, %c0_21, %c0_22], %35 {strides = array<i32>} : memref<4x6x64xf32, #tpu.memory_space<vmem>>, vector<1x6x64xf32>,
    return
  }
  func.func @transform_0(%arg0: i32, %arg1: i32) -> (i32, i32, i32) {
    %c0_i32 = arith.constant 0 : i32
    %c0_i32_0 = arith.constant 0 : i32
    return %c0_i32, %arg0, %arg1 : i32, i32, i32
  }
  func.func @transform_1(%arg0: i32, %arg1: i32) -> (i32, i32, i32) {
    %c0_i32 = arith.constant 0 : i32
    %c0_i32_0 = arith.constant 0 : i32
    return %c0_i32, %arg0, %arg1 : i32, i32, i32
  }
}

module attributes {stable_mosaic.version = 11 : i64} {
  func.func @_dwt_norm_kernel(%arg0: i32, %arg1: i32, %arg2: memref<6x256xf32, #tpu.memory_space<vmem>>, %arg3: memref<4x6x64xf32, #tpu.memory_space<vmem>>, %arg4: memref<6x256xf32, #tpu.memory_space<vmem>>, %arg5: memref<4x6x64xf32, #tpu.memory_space<vmem>>) attributes {dimension_semantics = [#tpu.dimension_semantics<parallel>, #tpu.dimension_semantics<parallel>], iteration_bounds = array<i64: 1, 1>, scalar_prefetch = 0 : i64, scratch_operands = 0 : i64, tpu.core_type = #tpu.core_type<tc>, window_params = [{transform_indices = @transform_0, window_bounds = array<i64: 6, 256>}, {transform_indices = @transform_1, window_bounds = array<i64: 4, 6, 64>}, {transform_indices = @transform_2, window_bounds = array<i64: 6, 256>}, {transform_indices = @transform_3, window_bounds = array<i64: 4, 6, 64>}]} {
    %c0 = arith.constant 0 : index
    %c0_0 = arith.constant 0 : index
    %0 = vector.load %arg2[%c0, %c0_0] : memref<6x256xf32, #tpu.memory_space<vmem>>, vector<6x256xf32>
    %cst = arith.constant 2.000000e+00 : f32
    %1 = vector.broadcast %cst : f32 to vector<6x256xf32>
    %2 = arith.mulf %1, %0 : vector<6x256xf32>
    %cst_1 = arith.constant 1.000000e+00 : f32
    %3 = vector.broadcast %cst_1 : f32 to vector<6x256xf32>
    %4 = arith.subf %2, %3 : vector<6x256xf32>
    %c0_2 = arith.constant 0 : index
    %c0_3 = arith.constant 0 : index
    %5 = vector.load %arg4[%c0_2, %c0_3] : memref<6x256xf32, #tpu.memory_space<vmem>>, vector<6x256xf32>
    tpu.vector_store %arg4[%c0_2, %c0_3], %4 {strides = array<i32>} : memref<6x256xf32, #tpu.memory_space<vmem>>, vector<6x256xf32>,
    %c0_4 = arith.constant 0 : index
    %c0_5 = arith.constant 0 : index
    %c0_6 = arith.constant 0 : index
    %6 = vector.load %arg3[%c0_4, %c0_5, %c0_6] : memref<4x6x64xf32, #tpu.memory_space<vmem>>, vector<1x6x64xf32>
    %7 = vector.shape_cast %6 : vector<1x6x64xf32> to vector<6x64xf32>
    %c1 = arith.constant 1 : index
    %c0_7 = arith.constant 0 : index
    %c0_8 = arith.constant 0 : index
    %8 = vector.load %arg3[%c1, %c0_7, %c0_8] : memref<4x6x64xf32, #tpu.memory_space<vmem>>, vector<1x6x64xf32>
    %9 = vector.shape_cast %8 : vector<1x6x64xf32> to vector<6x64xf32>
    %c2 = arith.constant 2 : index
    %c0_9 = arith.constant 0 : index
    %c0_10 = arith.constant 0 : index
    %10 = vector.load %arg3[%c2, %c0_9, %c0_10] : memref<4x6x64xf32, #tpu.memory_space<vmem>>, vector<1x6x64xf32>
    %11 = vector.shape_cast %10 : vector<1x6x64xf32> to vector<6x64xf32>
    %c3 = arith.constant 3 : index
    %c0_11 = arith.constant 0 : index
    %c0_12 = arith.constant 0 : index
    %12 = vector.load %arg3[%c3, %c0_11, %c0_12] : memref<4x6x64xf32, #tpu.memory_space<vmem>>, vector<1x6x64xf32>
    %13 = vector.shape_cast %12 : vector<1x6x64xf32> to vector<6x64xf32>
    %14 = arith.addf %7, %9 : vector<6x64xf32>
    %cst_13 = arith.constant 5.000000e-01 : f32
    %15 = vector.broadcast %cst_13 : f32 to vector<6x64xf32>
    %16 = arith.mulf %15, %14 : vector<6x64xf32>
    %17 = arith.addf %11, %13 : vector<6x64xf32>
    %cst_14 = arith.constant 5.000000e-01 : f32
    %18 = vector.broadcast %cst_14 : f32 to vector<6x64xf32>
    %19 = arith.mulf %18, %17 : vector<6x64xf32>
    %20 = arith.subf %9, %7 : vector<6x64xf32>
    %cst_15 = arith.constant 5.000000e-01 : f32
    %21 = vector.broadcast %cst_15 : f32 to vector<6x64xf32>
    %22 = arith.mulf %21, %20 : vector<6x64xf32>
    %23 = arith.subf %13, %11 : vector<6x64xf32>
    %cst_16 = arith.constant 5.000000e-01 : f32
    %24 = vector.broadcast %cst_16 : f32 to vector<6x64xf32>
    %25 = arith.mulf %24, %23 : vector<6x64xf32>
    %26 = arith.addf %16, %19 : vector<6x64xf32>
    %c0_17 = arith.constant 0 : index
    %c0_18 = arith.constant 0 : index
    %c0_19 = arith.constant 0 : index
    %27 = vector.load %arg5[%c0_17, %c0_18, %c0_19] : memref<4x6x64xf32, #tpu.memory_space<vmem>>, vector<1x6x64xf32>
    %28 = vector.shape_cast %27 : vector<1x6x64xf32> to vector<6x64xf32>
    %29 = vector.shape_cast %26 : vector<6x64xf32> to vector<1x6x64xf32>
    tpu.vector_store %arg5[%c0_17, %c0_18, %c0_19], %29 {strides = array<i32>} : memref<4x6x64xf32, #tpu.memory_space<vmem>>, vector<1x6x64xf32>,
    %30 = arith.subf %19, %16 : vector<6x64xf32>
    %c1_20 = arith.constant 1 : index
    %c0_21 = arith.constant 0 : index
    %c0_22 = arith.constant 0 : index
    %31 = vector.load %arg5[%c1_20, %c0_21, %c0_22] : memref<4x6x64xf32, #tpu.memory_space<vmem>>, vector<1x6x64xf32>
    %32 = vector.shape_cast %31 : vector<1x6x64xf32> to vector<6x64xf32>
    %33 = vector.shape_cast %30 : vector<6x64xf32> to vector<1x6x64xf32>
    tpu.vector_store %arg5[%c1_20, %c0_21, %c0_22], %33 {strides = array<i32>} : memref<4x6x64xf32, #tpu.memory_space<vmem>>, vector<1x6x64xf32>,
    %34 = arith.addf %22, %25 : vector<6x64xf32>
    %c2_23 = arith.constant 2 : index
    %c0_24 = arith.constant 0 : index
    %c0_25 = arith.constant 0 : index
    %35 = vector.load %arg5[%c2_23, %c0_24, %c0_25] : memref<4x6x64xf32, #tpu.memory_space<vmem>>, vector<1x6x64xf32>
    %36 = vector.shape_cast %35 : vector<1x6x64xf32> to vector<6x64xf32>
    %37 = vector.shape_cast %34 : vector<6x64xf32> to vector<1x6x64xf32>
    tpu.vector_store %arg5[%c2_23, %c0_24, %c0_25], %37 {strides = array<i32>} : memref<4x6x64xf32, #tpu.memory_space<vmem>>, vector<1x6x64xf32>,
    %38 = arith.subf %25, %22 : vector<6x64xf32>
    %c3_26 = arith.constant 3 : index
    %c0_27 = arith.constant 0 : index
    %c0_28 = arith.constant 0 : index
    %39 = vector.load %arg5[%c3_26, %c0_27, %c0_28] : memref<4x6x64xf32, #tpu.memory_space<vmem>>, vector<1x6x64xf32>
    %40 = vector.shape_cast %39 : vector<1x6x64xf32> to vector<6x64xf32>
    %41 = vector.shape_cast %38 : vector<6x64xf32> to vector<1x6x64xf32>
    tpu.vector_store %arg5[%c3_26, %c0_27, %c0_28], %41 {strides = array<i32>} : memref<4x6x64xf32, #tpu.memory_space<vmem>>, vector<1x6x64xf32>,
    return
  }
  func.func @transform_0(%arg0: i32, %arg1: i32) -> (i32, i32) {
    %c0_i32 = arith.constant 0 : i32
    return %arg0, %arg1 : i32, i32
  }
  func.func @transform_1(%arg0: i32, %arg1: i32) -> (i32, i32, i32) {
    %c0_i32 = arith.constant 0 : i32
    %c0_i32_0 = arith.constant 0 : i32
    return %c0_i32, %arg0, %arg1 : i32, i32, i32
  }
  func.func @transform_2(%arg0: i32, %arg1: i32) -> (i32, i32) {
    %c0_i32 = arith.constant 0 : i32
    return %arg0, %arg1 : i32, i32
  }
  func.func @transform_3(%arg0: i32, %arg1: i32) -> (i32, i32, i32) {
    %c0_i32 = arith.constant 0 : i32
    %c0_i32_0 = arith.constant 0 : i32
    return %c0_i32, %arg0, %arg1 : i32, i32, i32
  }
}

</mosaic_0001>

<bundles_post_ra>
// kernel: net_forward.4
= control target key start
LH: loop header
LB: loop body
LE: loop exit
PB: predicated region body
PF: predicated region fallthrough
CT: control target
= control target key end

     0   :  { %vm37_vm0 = vcmask 521216   ;;  %s120_s0 = inlined_call_operand.vmem [shape: f32[6,256], index: 0, kind: input, shape index: {}]   ;;  %s121_s1 = inlined_call_operand.vmem [shape: f32[4,6,64], index: 1, kind: input, shape index: {}]   ;;  %s122_s2 = inlined_call_operand.vmem [shape: f32[6,256], index: 2, kind: output, shape index: {0}]   ;;  %s123_s3 = inlined_call_operand.vmem [shape: f32[4,6,64], index: 3, kind: output, shape index: {1}]  }
   0x1   :  { %v13_v0 = vld [vmem:[%s120_s0] sm:$0x3f]  ;;  %v14_v1 = vld [vmem:[%s120_s0 + $0x8] sm:$0x3f]  ;;  %v59_v6 = vld [vmem:[%s121_s1 + $0x10] sm:$0x3f] }
   0x2   :  { %v21_v2 = vld [vmem:[%s121_s1] sm:$0x3f]  ;;  %v15_v3 = vmul.f32 2.0, %v13_v0  ;;  %v16_v4 = vmul.f32 2.0, %v14_v1  ;;  %v58_v5 = vld [vmem:[%s121_s1 + $0x8] sm:$0x3f] }
   0x3   :  { %v60_v7 = vld [vmem:[%s121_s1 + $0x18] sm:$0x3f]  ;;  %v28_v8 = vadd.f32 %v58_v5, %v21_v2  ;;  %v32_v9 = vsub.f32 %v58_v5, %v21_v2 }
   0x4   :  { %v56_v10 = vadd.f32 -1.0, %v15_v3  ;;  %v57_v11 = vadd.f32 -1.0, %v16_v4  ;;  %v30_v12 = vadd.f32 %v60_v7, %v59_v6  ;;  %v34_v13 = vsub.f32 %v60_v7, %v59_v6 }
   0x5   :  { %v29_v14 = vmul.f32 0.5, %v28_v8  ;;  %v33_v15 = vmul.f32 0.5, %v32_v9 }
   0x6   :  { %19 = vst [vmem:[%s122_s2] sm:$0x3f] %v56_v10  ;;  %20 = vst [vmem:[%s122_s2 + $0x8] sm:$0x3f] %v57_v11  ;;  %v31_v16 = vmul.f32 0.5, %v30_v12  ;;  %v35_v17 = vmul.f32 0.5, %v34_v13 }
   0x8   :  { %v36_v18 = vadd.f32 %v31_v16, %v29_v14  ;;  %v39_v19 = vsub.f32 %v31_v16, %v29_v14  ;;  %v42_v20 = vadd.f32 %v35_v17, %v33_v15  ;;  %v45_v21 = vsub.f32 %v35_v17, %v33_v15 }
   0xa   :  { %38 = vst.msk [vmem:[%s123_s3] sm:$0x3f] %vm37_vm0, %v36_v18  ;;  %61 = vst.msk [vmem:[%s123_s3 + $0x8] sm:$0x3f] %vm37_vm0, %v39_v19 }
   0xb   :  { %62 = vst.msk [vmem:[%s123_s3 + $0x10] sm:$0x3f] %vm37_vm0, %v42_v20  ;;  %63 = vst.msk [vmem:[%s123_s3 + $0x18] sm:$0x3f] %vm37_vm0, %v45_v21 }

// kernel: net_forward.5
= control target key start
LH: loop header
LB: loop body
LE: loop exit
PB: predicated region body
PF: predicated region fallthrough
CT: control target
= control target key end

     0   :  { %vm24_vm0 = vcmask 521216   ;;  %s79_s0 = inlined_call_operand.vmem [shape: f32[4,6,64], index: 0, kind: input, shape index: {}]   ;;  %s80_s1 = inlined_call_operand.vmem [shape: f32[4,6,64], index: 1, kind: output, shape index: {}]  }
   0x1   :  { %v8_v0 = vld [vmem:[%s79_s0] sm:$0x3f]  ;;  %v39_v1 = vld [vmem:[%s79_s0 + $0x8] sm:$0x3f]  ;;  %v40_v2 = vld [vmem:[%s79_s0 + $0x10] sm:$0x3f] }
   0x2   :  { %v41_v3 = vld [vmem:[%s79_s0 + $0x18] sm:$0x3f]  ;;  %v15_v4 = vsub.f32 %v8_v0, %v39_v1  ;;  %v19_v5 = vadd.f32 %v39_v1, %v8_v0 }
   0x3   :  { %v17_v6 = vsub.f32 %v40_v2, %v41_v3  ;;  %v21_v7 = vadd.f32 %v41_v3, %v40_v2 }
   0x4   :  { %v16_v8 = vmul.f32 0.5, %v15_v4  ;;  %v20_v9 = vmul.f32 0.5, %v19_v5 }
   0x5   :  { %v18_v10 = vmul.f32 0.5, %v17_v6  ;;  %v22_v11 = vmul.f32 0.5, %v21_v7 }
   0x7   :  { %v23_v12 = vsub.f32 %v16_v8, %v18_v10  ;;  %v26_v13 = vsub.f32 %v20_v9, %v22_v11  ;;  %v29_v14 = vadd.f32 %v18_v10, %v16_v8  ;;  %v32_v15 = vadd.f32 %v22_v11, %v20_v9 }
   0x9   :  { %25 = vst.msk [vmem:[%s80_s1] sm:$0x3f] %vm24_vm0, %v23_v12  ;;  %42 = vst.msk [vmem:[%s80_s1 + $0x8] sm:$0x3f] %vm24_vm0, %v26_v13 }
   0xa   :  { %43 = vst.msk [vmem:[%s80_s1 + $0x10] sm:$0x3f] %vm24_vm0, %v29_v14  ;;  %44 = vst.msk [vmem:[%s80_s1 + $0x18] sm:$0x3f] %vm24_vm0, %v32_v15 }

</bundles_post_ra>
